<compile_context>
chip_gen: v7x
topology: tpu7x:2x2x1
jax: 0.10.0
libtpu: 0.0.40
codegen_flags: <defaults>
</compile_context>

<pallas_src>
import functools
import math

import jax
import jax.numpy as jnp
from jax.experimental import pallas as pl
from jax.experimental.pallas import tpu as pltpu

IN_DIM = 128
HID_DIM = 256
OUT_DIM = 128
HALF_PI = math.pi / 2.0

# Degree-12 even Taylor coefficients for cos(t), Horner order (highest first).
_COS_COEFFS = (
    1.0 / 479001600.0,
    -1.0 / 3628800.0,
    1.0 / 40320.0,
    -1.0 / 720.0,
    1.0 / 24.0,
    -0.5,
    1.0,
)


def _round_up(n, m):
    return ((n + m - 1) // m) * m


def _default_elem_dtype():
    """bf16 elementwise math on v6e/v7x (native bf16 VPU/EUP); f32 on v5e and older."""
    try:
        kind = jax.devices()[0].device_kind.lower()
    except Exception:  # pragma: no cover - defensive
        kind = ""
    if any(v in kind for v in ("v2", "v3", "v4", "v5")):
        return jnp.float32
    return jnp.bfloat16


def hybrid_kernel(x_ref, w1_ref, b1_ref, w2_ref, b2_ref, o_ref, *, elem_dtype):
    # --- classical layer: bf16 MXU inputs (x cast in-kernel), f32 accumulation ---
    h32 = (
        jnp.dot(
            x_ref[...].astype(jnp.bfloat16),
            w1_ref[...],
            preferred_element_type=jnp.float32,
        )
        + b1_ref[...]
    )
    h = jnp.tanh(h32.astype(elem_dtype))  # EUP tanh (bf16-native on v6e/v7x)

    # --- analytic quantum circuit expectation values ---
    #   wire 0:  H then RY(t) -> <Z> = -sin(t) == cos(t + pi/2)
    #   wire i>0:       RY(t) -> <Z> =  cos(t)
    lane = jax.lax.broadcasted_iota(jnp.int32, h.shape, dimension=1)
    t = jnp.where(lane == 0, h + jnp.asarray(HALF_PI, elem_dtype), h)

    # Bounded-range cos: |t| <= 1 + pi/2 < 2.58 by construction, so a degree-12 even
    # polynomial (|err| < 1e-5 on the range) replaces the generic range-reduced cos.
    u = t * t
    p = jnp.asarray(_COS_COEFFS[0], elem_dtype)
    for c in _COS_COEFFS[1:]:
        p = p * u + jnp.asarray(c, elem_dtype)
    q = p.astype(jnp.bfloat16)  # MXU input dtype

    # --- recursive layer + sigmoid (tanh form: single EUP op, no divide) ---
    y = (
        jnp.dot(q, w2_ref[...], preferred_element_type=jnp.float32)
        + b2_ref[...]
    )
    o_ref[...] = 0.5 * (1.0 + jnp.tanh(0.5 * y))


@functools.partial(jax.jit, static_argnames=("tb", "elem_dtype"))
def _hybrid_impl(x, w1, b1, w2, b2, *, tb, elem_dtype):
    B = x.shape[0]
    b_pad = _round_up(B, 8)  # only pad to the sublane multiple (<= 7 extra rows)
    if b_pad != B:
        x = jnp.pad(x, ((0, b_pad - B), (0, 0)))

    tb_eff = min(_round_up(tb, 8), b_pad)
    if b_pad >= 16:
        # Ensure >= 2 grid steps so megacore (v7x) can shard the batch across both TCs;
        # the extra ~0.35us step is negligible on single-TC chips.
        tb_eff = min(tb_eff, _round_up(pl.cdiv(b_pad, 2), 8))
    grid = (pl.cdiv(b_pad, tb_eff),)

    # Weights are tiny and resident: cast once on host side of the call (not per step).
    w1_bf = w1.astype(jnp.bfloat16)
    w2_bf = w2.astype(jnp.bfloat16)

    cost = pl.CostEstimate(
        flops=2 * b_pad * (IN_DIM * HID_DIM + HID_DIM * OUT_DIM),
        transcendentals=b_pad * (HID_DIM + OUT_DIM),
        bytes_accessed=(
            b_pad * IN_DIM * 4                               # x (f32 in)
            + b_pad * OUT_DIM * 4                            # out (f32)
            + (IN_DIM * HID_DIM + HID_DIM * OUT_DIM) * 2     # weights (bf16)
            + (HID_DIM + OUT_DIM) * 4                        # biases (f32)
        ),
    )

    out = pl.pallas_call(
        functools.partial(hybrid_kernel, elem_dtype=elem_dtype),
        out_shape=jax.ShapeDtypeStruct((b_pad, OUT_DIM), jnp.float32),
        grid=grid,
        in_specs=[
            pl.BlockSpec((tb_eff, IN_DIM), lambda i: (i, 0)),    # x: tiled over batch
            pl.BlockSpec((IN_DIM, HID_DIM), lambda i: (0, 0)),   # w1: resident
            pl.BlockSpec((1, HID_DIM), lambda i: (0, 0)),        # b1: resident
            pl.BlockSpec((HID_DIM, OUT_DIM), lambda i: (0, 0)),  # w2: resident
            pl.BlockSpec((1, OUT_DIM), lambda i: (0, 0)),        # b2: resident
        ],
        out_specs=pl.BlockSpec((tb_eff, OUT_DIM), lambda i: (i, 0)),
        compiler_params=pltpu.CompilerParams(
            dimension_semantics=("parallel",),
        ),
        cost_estimate=cost,
    )(x, w1_bf, b1, w2_bf, b2)

    return out if b_pad == B else out[:B]


def quantum_classical_hybrid(x, w1, b1, w2, b2, *, tb=1024, elem_dtype=None):
    if elem_dtype is None:
        elem_dtype = _default_elem_dtype()
    return _hybrid_impl(x, w1, b1, w2, b2, tb=tb, elem_dtype=elem_dtype)


def _reference(x, w1, b1, w2, b2):
    # Pure f32 reference with the original sin/cos/select formulation.
    h = jnp.tanh(x @ w1 + b1)
    lane = jnp.arange(h.shape[1])[None, :]
    q = jnp.where(lane == 0, -jnp.sin(h), jnp.cos(h))
    return jax.nn.sigmoid(q @ w2 + b2)


if __name__ == "__main__":
    key = jax.random.PRNGKey(0)
    kx, k1, k2, k3, k4 = jax.random.split(key, 5)
    B = 2

    x = jax.random.normal(kx, (B, IN_DIM), dtype=jnp.float32)
    # Deterministic synthetic parameters (shapes from nn.Linear(128,256)/(256,128)).
    w1 = jax.random.normal(k1, (IN_DIM, HID_DIM), dtype=jnp.float32) * 0.05
    b1 = jax.random.normal(k2, (1, HID_DIM), dtype=jnp.float32) * 0.05
    w2 = jax.random.normal(k3, (HID_DIM, OUT_DIM), dtype=jnp.float32) * 0.05
    b2 = jax.random.normal(k4, (1, OUT_DIM), dtype=jnp.float32) * 0.05

    out = quantum_classical_hybrid(x, w1, b1, w2, b2)
    jax.block_until_ready(out)

    ref = _reference(x, w1, b1, w2, b2)
    assert out.shape == (B, OUT_DIM)
    # bf16 MXU inputs + (on v6e/v7x) bf16 elementwise chain vs f32 reference: error on a
    # sigmoid output is ~1e-3; 2e-2 gives margin.
    assert jnp.allclose(out, ref, atol=2e-2, rtol=0.0), float(
        jnp.max(jnp.abs(out - ref))
    )

    print("KERNEL_OK")
</pallas_src>

<mosaic_0001>
module attributes {stable_mosaic.version = 11 : i64} {
  func.func @hybrid_kernel(%arg0: i32, %arg1: memref<8x128xf32, #tpu.memory_space<vmem>>, %arg2: memref<128x256xbf16, #tpu.memory_space<vmem>>, %arg3: memref<1x256xf32, #tpu.memory_space<vmem>>, %arg4: memref<256x128xbf16, #tpu.memory_space<vmem>>, %arg5: memref<1x128xf32, #tpu.memory_space<vmem>>, %arg6: memref<8x128xf32, #tpu.memory_space<vmem>>) attributes {dimension_semantics = [#tpu.dimension_semantics<parallel>], iteration_bounds = array<i64: 1>, scalar_prefetch = 0 : i64, scratch_operands = 0 : i64, tpu.core_type = #tpu.core_type<tc>, window_params = [{transform_indices = @transform_0, window_bounds = array<i64: 8, 128>}, {pipeline_mode = #tpu.pipeline_mode<synchronous>, transform_indices = @transform_1, window_bounds = array<i64: 128, 256>}, {pipeline_mode = #tpu.pipeline_mode<synchronous>, transform_indices = @transform_2, window_bounds = array<i64: 1, 256>}, {pipeline_mode = #tpu.pipeline_mode<synchronous>, transform_indices = @transform_3, window_bounds = array<i64: 256, 128>}, {pipeline_mode = #tpu.pipeline_mode<synchronous>, transform_indices = @transform_4, window_bounds = array<i64: 1, 128>}, {transform_indices = @transform_5, window_bounds = array<i64: 8, 128>}]} {
    %c0 = arith.constant 0 : index
    %c0_0 = arith.constant 0 : index
    %0 = vector.load %arg1[%c0, %c0_0] : memref<8x128xf32, #tpu.memory_space<vmem>>, vector<8x128xf32>
    %1 = arith.truncf %0 : vector<8x128xf32> to vector<8x128xbf16>
    %c0_1 = arith.constant 0 : index
    %c0_2 = arith.constant 0 : index
    %2 = vector.load %arg2[%c0_1, %c0_2] : memref<128x256xbf16, #tpu.memory_space<vmem>>, vector<128x256xbf16>
    %cst = arith.constant dense<0.000000e+00> : vector<8x256xf32>
    %3 = tpu.matmul %1, %2, %cst {dimension_numbers = #tpu.dot_dimension_numbers<[1], [0], [0], [1], [0, 0, 1, 1], [], []>} : vector<8x128xbf16>, vector<128x256xbf16>, vector<8x256xf32> -> vector<8x256xf32>
    %c0_3 = arith.constant 0 : index
    %c0_4 = arith.constant 0 : index
    %4 = vector.load %arg3[%c0_3, %c0_4] : memref<1x256xf32, #tpu.memory_space<vmem>>, vector<1x256xf32>
    %5 = vector.broadcast %4 : vector<1x256xf32> to vector<8x256xf32>
    %6 = arith.addf %3, %5 : vector<8x256xf32>
    %7 = arith.truncf %6 : vector<8x256xf32> to vector<8x256xbf16>
    %8 = math.tanh %7 : vector<8x256xbf16>
    %9 = tpu.iota {dimensions = array<i32: 1>} : vector<8x256xi32>
    %c0_i32 = arith.constant 0 : i32
    %10 = vector.broadcast %c0_i32 : i32 to vector<8x256xi32>
    %11 = arith.cmpi eq, %9, %10 : vector<8x256xi32>
    %cst_5 = arith.constant 1.570310e+00 : bf16
    %12 = vector.broadcast %cst_5 : bf16 to vector<8x256xbf16>
    %13 = arith.addf %8, %12 : vector<8x256xbf16>
    %14 = arith.select %11, %13, %8 : vector<8x256xi1>, vector<8x256xbf16>
    %15 = arith.mulf %14, %14 : vector<8x256xbf16>
    %cst_6 = arith.constant 2.080920e-09 : bf16
    %16 = vector.broadcast %cst_6 : bf16 to vector<8x256xbf16>
    %17 = arith.mulf %16, %15 : vector<8x256xbf16>
    %cst_7 = arith.constant -2.756710e-07 : bf16
    %18 = vector.broadcast %cst_7 : bf16 to vector<8x256xbf16>
    %19 = arith.addf %17, %18 : vector<8x256xbf16>
    %20 = arith.mulf %19, %15 : vector<8x256xbf16>
    %cst_8 = arith.constant 2.479550e-05 : bf16
    %21 = vector.broadcast %cst_8 : bf16 to vector<8x256xbf16>
    %22 = arith.addf %20, %21 : vector<8x256xbf16>
    %23 = arith.mulf %22, %15 : vector<8x256xbf16>
    %cst_9 = arith.constant -1.388550e-03 : bf16
    %24 = vector.broadcast %cst_9 : bf16 to vector<8x256xbf16>
    %25 = arith.addf %23, %24 : vector<8x256xbf16>
    %26 = arith.mulf %25, %15 : vector<8x256xbf16>
    %cst_10 = arith.constant 4.174800e-02 : bf16
    %27 = vector.broadcast %cst_10 : bf16 to vector<8x256xbf16>
    %28 = arith.addf %26, %27 : vector<8x256xbf16>
    %29 = arith.mulf %28, %15 : vector<8x256xbf16>
    %cst_11 = arith.constant -5.000000e-01 : bf16
    %30 = vector.broadcast %cst_11 : bf16 to vector<8x256xbf16>
    %31 = arith.addf %29, %30 : vector<8x256xbf16>
    %32 = arith.mulf %31, %15 : vector<8x256xbf16>
    %cst_12 = arith.constant 1.000000e+00 : bf16
    %33 = vector.broadcast %cst_12 : bf16 to vector<8x256xbf16>
    %34 = arith.addf %32, %33 : vector<8x256xbf16>
    %c0_13 = arith.constant 0 : index
    %c0_14 = arith.constant 0 : index
    %35 = vector.load %arg4[%c0_13, %c0_14] : memref<256x128xbf16, #tpu.memory_space<vmem>>, vector<256x128xbf16>
    %cst_15 = arith.constant dense<0.000000e+00> : vector<8x128xf32>
    %36 = tpu.matmul %34, %35, %cst_15 {dimension_numbers = #tpu.dot_dimension_numbers<[1], [0], [0], [1], [0, 0, 1, 1], [], []>} : vector<8x256xbf16>, vector<256x128xbf16>, vector<8x128xf32> -> vector<8x128xf32>
    %c0_16 = arith.constant 0 : index
    %c0_17 = arith.constant 0 : index
    %37 = vector.load %arg5[%c0_16, %c0_17] : memref<1x128xf32, #tpu.memory_space<vmem>>, vector<1x128xf32>
    %38 = vector.broadcast %37 : vector<1x128xf32> to vector<8x128xf32>
    %39 = arith.addf %36, %38 : vector<8x128xf32>
    %cst_18 = arith.constant 5.000000e-01 : f32
    %40 = vector.broadcast %cst_18 : f32 to vector<8x128xf32>
    %41 = arith.mulf %40, %39 : vector<8x128xf32>
    %42 = math.tanh %41 : vector<8x128xf32>
    %cst_19 = arith.constant 1.000000e+00 : f32
    %43 = vector.broadcast %cst_19 : f32 to vector<8x128xf32>
    %44 = arith.addf %43, %42 : vector<8x128xf32>
    %cst_20 = arith.constant 5.000000e-01 : f32
    %45 = vector.broadcast %cst_20 : f32 to vector<8x128xf32>
    %46 = arith.mulf %45, %44 : vector<8x128xf32>
    %c0_21 = arith.constant 0 : index
    %c0_22 = arith.constant 0 : index
    %47 = vector.load %arg6[%c0_21, %c0_22] : memref<8x128xf32, #tpu.memory_space<vmem>>, vector<8x128xf32>
    tpu.vector_store %arg6[%c0_21, %c0_22], %46 {strides = array<i32>} : memref<8x128xf32, #tpu.memory_space<vmem>>, vector<8x128xf32>,
    return
  }
  func.func @transform_0(%arg0: i32) -> (i32, i32) {
    %c0_i32 = arith.constant 0 : i32
    %c0_i32_0 = arith.constant 0 : i32
    return %arg0, %c0_i32 : i32, i32
  }
  func.func @transform_1(%arg0: i32) -> (i32, i32) {
    %c0_i32 = arith.constant 0 : i32
    %c0_i32_0 = arith.constant 0 : i32
    %c0_i32_1 = arith.constant 0 : i32
    return %c0_i32, %c0_i32_0 : i32, i32
  }
  func.func @transform_2(%arg0: i32) -> (i32, i32) {
    %c0_i32 = arith.constant 0 : i32
    %c0_i32_0 = arith.constant 0 : i32
    %c0_i32_1 = arith.constant 0 : i32
    return %c0_i32, %c0_i32_0 : i32, i32
  }
  func.func @transform_3(%arg0: i32) -> (i32, i32) {
    %c0_i32 = arith.constant 0 : i32
    %c0_i32_0 = arith.constant 0 : i32
    %c0_i32_1 = arith.constant 0 : i32
    return %c0_i32, %c0_i32_0 : i32, i32
  }
  func.func @transform_4(%arg0: i32) -> (i32, i32) {
    %c0_i32 = arith.constant 0 : i32
    %c0_i32_0 = arith.constant 0 : i32
    %c0_i32_1 = arith.constant 0 : i32
    return %c0_i32, %c0_i32_0 : i32, i32
  }
  func.func @transform_5(%arg0: i32) -> (i32, i32) {
    %c0_i32 = arith.constant 0 : i32
    %c0_i32_0 = arith.constant 0 : i32
    return %arg0, %c0_i32 : i32, i32
  }
}

</mosaic_0001>

<bundles_post_ra>
// kernel: _hybrid_impl.1
= control target key start
LH: loop header
LB: loop body
LE: loop exit
PB: predicated region body
PF: predicated region fallthrough
CT: control target
= control target key end

     0   :  { %v520_v1 = vmov 0   ;;  %v51_v35 = vlaneseq  ;;  %vm521_vm1 = vmmov 0   ;;  %s662_s1 = inlined_call_operand.vmem [shape: bf16[128,256], index: 1, kind: input, shape index: {}]   ;;  %s663_s0 = inlined_call_operand.vmem [shape: f32[8,128], index: 0, kind: input, shape index: {}]   ;;  %s664_s3 = inlined_call_operand.vmem [shape: bf16[256,128], index: 3, kind: input, shape index: {}]   ;;  %s665_s2 = inlined_call_operand.vmem [shape: f32[1,256], index: 2, kind: input, shape index: {}]   ;;  %s666_s4 = inlined_call_operand.vmem [shape: f32[1,128], index: 4, kind: input, shape index: {}]   ;;  %s667_s5 = inlined_call_operand.vmem [shape: f32[8,128], index: 5, kind: output, shape index: {}]  }
   0x1   :  { %v474_v0 = vld [vmem:[%s662_s1 + $0x4] ss:$8 sps:$4 sm:$0xff]   ;;  %173 = vmatprep.mubr.bf16.mxu0 %v520_v1  ;;  %v476_v2 = vld [vmem:[%s662_s1] ss:$8 sps:$4 sm:$0xff]   ;;  %v477_v3 = vld [vmem:[%s662_s1 + $0x14] ss:$8 sps:$4 sm:$0xff]  }
   0x2   :  { %141 = vmatprep.subr.bf16.mxu0 %v474_v0  ;;  %v479_v4 = vld [vmem:[%s662_s1 + $0x10] ss:$8 sps:$4 sm:$0xff]   ;;  %v480_v5 = vld [vmem:[%s662_s1 + $0x24] ss:$8 sps:$4 sm:$0xff]   ;;  %v482_v6 = vld [vmem:[%s662_s1 + $0x20] ss:$8 sps:$4 sm:$0xff]  }
   0x3   :  { %142 = vmatpush1.bf16.msra.mxu0 %v476_v2  ;;  %v483_v7 = vld [vmem:[%s662_s1 + $0x34] ss:$8 sps:$4 sm:$0xff]   ;;  %v485_v8 = vld [vmem:[%s662_s1 + $0x30] ss:$8 sps:$4 sm:$0xff]   ;;  %v486_v9 = vld [vmem:[%s662_s1 + $0x44] ss:$8 sps:$4 sm:$0xff]  }
   0x4   :  { %143 = vmatprep.subr.bf16.mxu0 %v477_v3  ;;  %v488_v10 = vld [vmem:[%s662_s1 + $0x40] ss:$8 sps:$4 sm:$0xff]   ;;  %v489_v11 = vld [vmem:[%s662_s1 + $0x54] ss:$8 sps:$4 sm:$0xff]   ;;  %v491_v12 = vld [vmem:[%s662_s1 + $0x50] ss:$8 sps:$4 sm:$0xff]  }
   0x5   :  { %v492_v13 = vld [vmem:[%s662_s1 + $0x64] ss:$8 sps:$4 sm:$0xff]   ;;  %v494_v14 = vld [vmem:[%s662_s1 + $0x60] ss:$8 sps:$4 sm:$0xff]   ;;  %v495_v15 = vld [vmem:[%s662_s1 + $0x74] ss:$8 sps:$4 sm:$0xff]  }
   0x6   :  { %v497_v16 = vld [vmem:[%s662_s1 + $0x70] ss:$8 sps:$4 sm:$0xff]   ;;  %v31_v17 = vld [vmem:[%s663_s0] sm:$0xff]  ;;  %v500_v21 = vld [vmem:[%s664_s3 + $0x48] sm:$0xff]   ;;  %v52_v36 = vshrl.u32 %v51_v35, 7  ;;  %v187_v42 = vand.u32 127, %v51_v35 }
   0x7   :  { %144 = vmatpush1.bf16.msra.mxu0 %v479_v4  ;;  %v32_v18 = vpack.c.bf16 %v31_v17, %v31_v17  ;;  %v498_v19 = vld [vmem:[%s664_s3 + $0x40] sm:$0xff]   ;;  %v501_v22 = vld [vmem:[%s664_s3 + $0x8] sm:$0xff]   ;;  %v502_v23 = vld [vmem:[%s664_s3 + $0x50] sm:$0xff]  }
   0x8   :  { %145 = vmatprep.subr.bf16.mxu0 %v480_v5  ;;  %v499_v20 = vld [vmem:[%s664_s3] sm:$0xff]   ;;  %450 = vmatprep.subr.bf16.mxu1 %v498_v19  ;;  %v503_v24 = vld [vmem:[%s664_s3 + $0x10] sm:$0xff]   ;;  %v504_v25 = vld [vmem:[%s664_s3 + $0x58] sm:$0xff]   ;;  %v53_v37 = vsub.s32 0, %v52_v36  ;;  %v57_v39 = vsub.s32 1, %v52_v36  ;;  %vm189_vm0 = vcmp.eq.s32.totalorder %v187_v42, 0 }
   0x9   :  { %451 = vmatpush3.bf16.msra.mxu1 %v499_v20  ;;  %v505_v26 = vld [vmem:[%s664_s3 + $0x18] sm:$0xff]   ;;  %v506_v27 = vld [vmem:[%s664_s3 + $0x60] sm:$0xff]   ;;  %v508_v29 = vld [vmem:[%s664_s3 + $0x68] sm:$0xff]   ;;  %v201_v52 = vsub.s32 4, %v52_v36 }
   0xa   :  { %452 = vmatprep.subr.bf16.mxu1 %v500_v21  ;;  %v507_v28 = vld [vmem:[%s664_s3 + $0x20] sm:$0xff]   ;;  %v509_v30 = vld [vmem:[%s664_s3 + $0x28] sm:$0xff]   ;;  %v510_v31 = vld [vmem:[%s664_s3 + $0x70] sm:$0xff]  }
   0xb   :  { %146 = vmatpush1.bf16.msra.mxu0 %v482_v6  ;;  %v511_v32 = vld [vmem:[%s664_s3 + $0x30] sm:$0xff]   ;;  %v512_v33 = vld [vmem:[%s664_s3 + $0x78] sm:$0xff]   ;;  %v49_v38 = vld [vmem:[%s665_s2] sm:$0x3] }
   0xc   :  { %147 = vmatprep.subr.bf16.mxu0 %v483_v7  ;;  %v513_v34 = vld [vmem:[%s664_s3 + $0x38] sm:$0xff]   ;;  %v54_v40 = vrot.slane %v49_v38, %v53_v37  ;;  %v58_v41 = vrot.slane %v49_v38, %v57_v39  ;;  %vm193_vm2 = vmpackc.low %vm521_vm1, %vm189_vm0 }
   0xd   :  { %453 = vmatpush3.bf16.msra.mxu1 %v501_v22  ;;  %v194_v51 = vsel %vm193_vm2, 65537, %v520_v1 }
   0xe   :  { %454 = vmatprep.subr.bf16.mxu1 %v502_v23  ;;  %v198_v53 = vrot.slane %v194_v51, %v53_v37  ;;  %v202_v54 = vrot.slane %v194_v51, %v201_v52 }
   0xf   :  { %148 = vmatpush1.bf16.msra.mxu0 %v485_v8 }
  0x10   :  { %149 = vmatprep.subr.bf16.mxu0 %v486_v9  ;;  %vm203_vm3 = vcmp.ne.s16.totalorder %v198_v53, 0  ;;  %vm204_vm4 = vcmp.ne.s16.totalorder %v202_v54, 0 }
  0x11   :  { %455 = vmatpush3.bf16.msra.mxu1 %v503_v24  ;;  %v433_v24 = vld [vmem:[%s666_s4] ss:$0 sm:$0xff] }
  0x12   :  { %456 = vmatprep.subr.bf16.mxu1 %v504_v25 }
  0x13   :  { %150 = vmatpush1.bf16.msra.mxu0 %v488_v10 }
  0x14   :  { %151 = vmatprep.subr.bf16.mxu0 %v489_v11 }
  0x15   :  { %457 = vmatpush3.bf16.msra.mxu1 %v505_v26 }
  0x16   :  { %458 = vmatprep.subr.bf16.mxu1 %v506_v27 }
  0x17   :  { %152 = vmatpush1.bf16.msra.mxu0 %v491_v12 }
  0x18   :  { %153 = vmatprep.subr.bf16.mxu0 %v492_v13 }
  0x19   :  { %459 = vmatpush3.bf16.msra.mxu1 %v507_v28 }
  0x1a   :  { %460 = vmatprep.subr.bf16.mxu1 %v508_v29 }
  0x1b   :  { %154 = vmatpush1.bf16.msra.mxu0 %v494_v14 }
  0x1c   :  { %155 = vmatprep.subr.bf16.mxu0 %v495_v15 }
  0x1d   :  { %461 = vmatpush3.bf16.msra.mxu1 %v509_v30 }
  0x1e   :  { %462 = vmatprep.subr.bf16.mxu1 %v510_v31 }
  0x1f   :  { %156 = vmatpush1.bf16.msra.mxu0 %v497_v16 }
  0x21   :  { %463 = vmatpush3.bf16.msra.mxu1 %v511_v32 }
  0x22   :  { %174 = vmatmul.mubr.bf16.vlgmr.msra.gmra.mrb[0].mxu0 %v32_v18  ;;  %464 = vmatprep.subr.bf16.mxu1 %v512_v33 }
  0x25   :  { %465 = vmatpush3.bf16.msra.mxu1 %v513_v34 }
  0xf5   :  { %v175_v43 = vpop.f32.mrb[0].mxu0 }
  0xf6   :  { %v176_v44 = vadd.f32 %v175_v43, %v54_v40  ;;  %v177_v45 = vpop.f32.mrb[1].mxu0 }
  0xf7   :  { %v178_v46 = vadd.f32 %v177_v45, %v58_v41  ;;  %v179_v47 = vpop.f32.mrb[2].mxu0 }
  0xf8   :  { %v182_v48 = vpack.c.bf16 %v176_v44, %v176_v44  ;;  %v180_v49 = vpop.f32.mrb[3].mxu0 }
  0xf9   :  { %v183_v50 = vpack.c.bf16 %v178_v46, %v178_v46 }
  0xfa   :  { %514 = vtanh.bf16 %v182_v48 }
  0xfb   :  { %516 = vtanh.bf16 %v183_v50 }
 0x105   :  { %v515_v55 = vpop.eup %514 }
 0x106   :  { %v517_v56 = vpop.eup %516  ;;  %v191_v57 = vadd.bf16 1070153673, %v515_v55 }
 0x107   :  { %v192_v58 = vadd.bf16 1070153673, %v517_v56 }
 0x108   :  { %v205_v59 = vsel %vm203_vm3, %v191_v57, %v515_v55 }
 0x109   :  { %v207_v60 = vmul.bf16 %v205_v59, %v205_v59  ;;  %v206_v61 = vsel %vm204_vm4, %v192_v58, %v517_v56 }
 0x10a   :  { %v208_v62 = vmul.bf16 %v206_v61, %v206_v61 }
 0x10b   :  { %v209_v63 = vmul.bf16 823079183, %v207_v60 }
 0x10c   :  { %v210_v0 = vmul.bf16 823079183, %v208_v62 }
 0x10d   :  { %v211_v2 = vadd.bf16 3029644436, %v209_v63 }
 0x10e   :  { %v212_v3 = vadd.bf16 3029644436, %v210_v0 }
 0x10f   :  { %v213_v4 = vmul.bf16 %v211_v2, %v207_v60 }
 0x110   :  { %v214_v5 = vmul.bf16 %v212_v3, %v208_v62 }
 0x111   :  { %v215_v1 = vadd.bf16 936392656, %v213_v4 }
 0x112   :  { %v216_v6 = vadd.bf16 936392656, %v214_v5 }
 0x113   :  { %v217_v7 = vmul.bf16 %v215_v1, %v207_v60 }
 0x114   :  { %v218_v8 = vmul.bf16 %v216_v6, %v208_v62 }
 0x115   :  { %v219_v9 = vadd.bf16 3132537526, %v217_v7 }
 0x116   :  { %v220_v10 = vadd.bf16 3132537526, %v218_v8 }
 0x117   :  { %v221_v11 = vmul.bf16 %v219_v9, %v207_v60 }
 0x118   :  { %v222_v12 = vmul.bf16 %v220_v10, %v208_v62 }
 0x119   :  { %v223_v13 = vadd.bf16 1026243883, %v221_v11 }
 0x11a   :  { %v224_v14 = vadd.bf16 1026243883, %v222_v12 }
 0x11b   :  { %v225_v15 = vmul.bf16 %v223_v13, %v207_v60 }
 0x11c   :  { %v226_v16 = vmul.bf16 %v224_v14, %v208_v62 }
 0x11d   :  { %v227_v17 = vadd.bf16 3204497152, %v225_v15 }
 0x11e   :  { %v228_v18 = vadd.bf16 3204497152, %v226_v16 }
 0x11f   :  { %v229_v19 = vmul.bf16 %v227_v17, %v207_v60 }
 0x120   :  { %v230_v20 = vmul.bf16 %v228_v18, %v208_v62 }
 0x121   :  { %v231_v22 = vadd.bf16 1065369472, %v229_v19 }
 0x122   :  { %v232_v21 = vadd.bf16 1065369472, %v230_v20 }
 0x124   :  { %400 = vmatprep.mubr.bf16.mxu1 %v232_v21 }
 0x125   :  { %401 = vmatmul.mubr.bf16.vlgmr.msra.gmra.mrb[0].mxu1 %v231_v22 }
 0x1f8   :  { %v466_v23 = vpop.f32.mrb[0].mxu1 }
 0x1f9   :  { %v467_v25 = vpop.f32.mrb[1].mxu1 }
 0x1fa   :  { %v468_v26 = vadd.f32 %v467_v25, %v466_v23  ;;  %v469_v27 = vpop.f32.mrb[2].mxu1 }
 0x1fb   :  { %v470_v28 = vpop.f32.mrb[3].mxu1 }
 0x1fc   :  { %v403_v29 = vadd.f32 %v468_v26, %v433_v24 }
 0x1fe   :  { %v408_v30 = vmul.f32 0.5, %v403_v29 }
 0x200   :  { %518 = vtanh.f32 %v408_v30 }
 0x20a   :  { %v519_v31 = vpop.eup %518 }
 0x20b   :  { %v410_v32 = vadd.f32 1.0, %v519_v31 }
 0x20d   :  { %v411_v33 = vmul.f32 0.5, %v410_v32 }
 0x20f   :  { %412 = vst [vmem:[%s667_s5] sm:$0xff] %v411_v33 }

</bundles_post_ra>
